<compile_context>
chip_gen: v6e
topology: v6e:2x2x1
jax: 0.10.0
libtpu: 0.0.40
codegen_flags: <defaults>
</compile_context>

<pallas_src>
import functools

import jax
import jax.numpy as jnp
from jax.experimental import pallas as pl
from jax.experimental.pallas import tpu as pltpu


def _cbam_channel_attention_kernel(x_ref, w1_ref, w2_ref, o_ref, acc_ref, *,
                                   inv_hw):
    """One (batch-row, HW-chunk) grid step of CBAM channel attention.

    x_ref  : (1, C, tHW)  current HW chunk of one batch row (native dtype)
    w1_ref : (C, Ch)      fc1 weight  (PyTorch (Ch, C, 1, 1) transposed)
    w2_ref : (Ch, C)      fc2 weight  (PyTorch (C, Ch, 1, 1) transposed)
    o_ref  : (1, 1, C)    sigmoid channel gate for this batch row
    acc_ref: (2, C) f32   row 0 = running sum, row 1 = running max
    """
    h = pl.program_id(1)
    c = acc_ref.shape[1]

    # ---- init running (sum, max) on the first HW chunk of this batch row.
    @pl.when(h == 0)
    def _():
        acc_ref[0:1, :] = jnp.zeros((1, c), jnp.float32)
        acc_ref[1:2, :] = jnp.full((1, c), -jnp.inf, jnp.float32)

    # ---- chunked global avg/max pooling over the lane-dense HW axis.
    x = x_ref[...]                                               # native dtype
    acc_ref[0:1, :] += jnp.sum(x.astype(jnp.float32), axis=-1)   # f32 accumulate
    acc_ref[1:2, :] = jnp.maximum(acc_ref[1:2, :],
                                  jnp.max(x, axis=-1).astype(jnp.float32))

    # ---- finalize on the last chunk: shared MLP + sigmoid.
    @pl.when(h == pl.num_programs(1) - 1)
    def _():
        # Fold 1/HW into the avg row only (max row untouched).
        acc_ref[0:1, :] *= jnp.float32(inv_hw)
        pooled = acc_ref[...]                                    # (2, C) = [avg ; max]
        w1 = w1_ref[...].astype(jnp.float32)
        w2 = w2_ref[...].astype(jnp.float32)
        # Single fused fc1 for both pooled rows: one MXU dot instead of two.
        hid = jnp.maximum(
            jnp.dot(pooled, w1, preferred_element_type=jnp.float32), 0.0)   # (2, Ch)
        # fc2 is linear & bias-free: fc2(a) + fc2(m) == fc2(a + m).
        hid = hid[0:1, :] + hid[1:2, :]                          # (1, Ch)
        logits = jnp.dot(hid, w2, preferred_element_type=jnp.float32)       # (1, C)
        gate = 1.0 / (1.0 + jnp.exp(-logits))                    # sigmoid
        o_ref[...] = gate.reshape(o_ref.shape).astype(o_ref.dtype)


def _pick_hw_tile(hw, c, itemsize, block_budget_bytes=2 * 1024 * 1024):
    """Largest lane-aligned (multiple-of-128) HW tile that divides HW and keeps
    one (1, C, tHW) input block within a per-buffer VMEM budget sized so the
    double-buffered pipeline stays far under v7x's scoped-VMEM default."""
    max_thw = max(128, (block_budget_bytes // max(1, c * itemsize)) // 128 * 128)
    if hw <= max_thw:
        return hw                          # whole spatial extent in one block
    best = None
    t = 128
    while t <= max_thw:
        if hw % t == 0:
            best = t
        t += 128
    # Fallback: no 128-aligned divisor of HW -- take the full extent (rare).
    return best if best is not None else hw


@jax.jit
def cbam_channel_attention(x_nchw, w1, w2):
    """x_nchw: (B, C, H, W); w1: (C, C//ratio); w2: (C//ratio, C).

    Returns (B, C, 1, 1), matching the PyTorch module output.
    """
    B, C, H, W = x_nchw.shape
    Ch = w1.shape[1]
    HW = H * W
    thw = _pick_hw_tile(HW, C, x_nchw.dtype.itemsize)
    n_hw = HW // thw

    # Free, contiguous reshape (stays in NCHW order): spatial goes on the lane
    # axis so every kernel block is lane-dense with zero transposes.
    x3 = x_nchw.reshape(B, C, HW)

    kernel = functools.partial(_cbam_channel_attention_kernel, inv_hw=1.0 / HW)

    out = pl.pallas_call(
        kernel,
        out_shape=jax.ShapeDtypeStruct((B, 1, C), x_nchw.dtype),
        grid_spec=pltpu.PrefetchScalarGridSpec(
            num_scalar_prefetch=0,
            # batch rows (megacore-parallel) x HW chunks (reduction, innermost)
            grid=(B, n_hw),
            in_specs=[
                pl.BlockSpec((1, C, thw), lambda b, h: (b, 0, h)),
                pl.BlockSpec((C, Ch), lambda b, h: (0, 0)),
                pl.BlockSpec((Ch, C), lambda b, h: (0, 0)),
            ],
            out_specs=pl.BlockSpec((1, 1, C), lambda b, h: (b, 0, 0)),
            scratch_shapes=[pltpu.VMEM((2, C), jnp.float32)],
        ),
        compiler_params=pltpu.CompilerParams(
            dimension_semantics=("parallel", "arbitrary")),
    )(x3, w1, w2)

    # Tiny (B*C elements) reshape back to the PyTorch output shape.
    return out.reshape(B, C, 1, 1)


def cbam_channel_attention_ref(x_nchw, w1, w2):
    """Pure-JAX reference mirroring the PyTorch forward exactly."""
    B, C, H, W = x_nchw.shape
    avg = jnp.mean(x_nchw.astype(jnp.float32), axis=(2, 3))          # (B, C)
    mx = jnp.max(x_nchw.astype(jnp.float32), axis=(2, 3))            # (B, C)

    def mlp(p):
        return jnp.maximum(p @ w1, 0.0) @ w2

    out = jax.nn.sigmoid(mlp(avg) + mlp(mx))                         # (B, C)
    return out.reshape(B, C, 1, 1).astype(x_nchw.dtype)


if __name__ == "__main__":
    def _check(B, C, H, W, ratio):
        Ch = C // ratio
        key = jax.random.PRNGKey(0)
        kx, k1, k2 = jax.random.split(key, 3)
        x = jax.random.normal(kx, (B, C, H, W), jnp.float32)
        # 1x1 conv weights stored as (in, out) matrices (== PyTorch (out,in,1,1)^T).
        w1 = jax.random.normal(k1, (C, Ch), jnp.float32) * 0.2   # fc1, no bias
        w2 = jax.random.normal(k2, (Ch, C), jnp.float32) * 0.2   # fc2, no bias

        out = jax.block_until_ready(cbam_channel_attention(x, w1, w2))
        ref = cbam_channel_attention_ref(x, w1, w2)
        assert out.shape == (B, C, 1, 1)
        err = float(jnp.max(jnp.abs(out - ref)))
        assert jnp.allclose(out, ref, rtol=1e-5, atol=1e-5), err

    # Module-default config (in_channels=64, ratio=16 -> hidden=4); HW fits in
    # a single lane-dense chunk per batch row.
    _check(B=2, C=64, H=16, W=16, ratio=16)
    # Larger spatial extent that exercises the chunked HW-reduction path
    # (HW=9216 splits into two 4608-wide lane-aligned chunks under the
    # per-block VMEM budget).
    _check(B=2, C=64, H=96, W=96, ratio=16)

    print("KERNEL_OK")
</pallas_src>

<mosaic_0001>
module attributes {stable_mosaic.version = 11 : i64} {
  func.func @_cbam_channel_attention_kernel(%arg0: i32, %arg1: i32, %arg2: memref<1x64x256xf32, #tpu.memory_space<vmem>>, %arg3: memref<64x4xf32, #tpu.memory_space<vmem>>, %arg4: memref<4x64xf32, #tpu.memory_space<vmem>>, %arg5: memref<1x1x64xf32, #tpu.memory_space<vmem>>, %arg6: memref<2x64xf32, #tpu.memory_space<vmem>>) attributes {dimension_semantics = [#tpu.dimension_semantics<parallel>, #tpu.dimension_semantics<arbitrary>], iteration_bounds = array<i64: 2, 1>, scalar_prefetch = 0 : i64, scratch_operands = 1 : i64, tpu.core_type = #tpu.core_type<tc>, window_params = [{transform_indices = @transform_0, window_bounds = array<i64: 1, 64, 256>}, {pipeline_mode = #tpu.pipeline_mode<synchronous>, transform_indices = @transform_1, window_bounds = array<i64: 64, 4>}, {pipeline_mode = #tpu.pipeline_mode<synchronous>, transform_indices = @transform_2, window_bounds = array<i64: 4, 64>}, {transform_indices = @transform_3, window_bounds = array<i64: 1, 1, 64>}]} {
    %c0_i32 = arith.constant 0 : i32
    %0 = arith.cmpi eq, %arg1, %c0_i32 : i32
    %1 = arith.extui %0 : i1 to i32
    %c0_i32_0 = arith.constant 0 : i32
    %2 = arith.cmpi ne, %1, %c0_i32_0 : i32
    scf.if %2 {
      %cst_13 = arith.constant 0.000000e+00 : f32
      %15 = vector.broadcast %cst_13 : f32 to vector<1x64xf32>
      %c0_14 = arith.constant 0 : index
      %c0_15 = arith.constant 0 : index
      %16 = vector.load %arg6[%c0_14, %c0_15] : memref<2x64xf32, #tpu.memory_space<vmem>>, vector<1x64xf32>
      tpu.vector_store %arg6[%c0_14, %c0_15], %15 {strides = array<i32>} : memref<2x64xf32, #tpu.memory_space<vmem>>, vector<1x64xf32>,
      %cst_16 = arith.constant 0xFF800000 : f32
      %17 = vector.broadcast %cst_16 : f32 to vector<1x64xf32>
      %c1_17 = arith.constant 1 : index
      %c0_18 = arith.constant 0 : index
      %18 = vector.load %arg6[%c1_17, %c0_18] : memref<2x64xf32, #tpu.memory_space<vmem>>, vector<1x64xf32>
      tpu.vector_store %arg6[%c1_17, %c0_18], %17 {strides = array<i32>} : memref<2x64xf32, #tpu.memory_space<vmem>>, vector<1x64xf32>,
    } else {
    }
    %c0 = arith.constant 0 : index
    %c0_1 = arith.constant 0 : index
    %c0_2 = arith.constant 0 : index
    %3 = vector.load %arg2[%c0, %c0_1, %c0_2] : memref<1x64x256xf32, #tpu.memory_space<vmem>>, vector<1x64x256xf32>
    %c0_3 = arith.constant 0 : index
    %c0_4 = arith.constant 0 : index
    %4 = vector.load %arg6[%c0_3, %c0_4] : memref<2x64xf32, #tpu.memory_space<vmem>>, vector<1x64xf32>
    %cst = arith.constant dense<0.000000e+00> : vector<1x64xf32>
    %5 = vector.multi_reduction <add>, %3, %cst [2] : vector<1x64x256xf32> to vector<1x64xf32>
    %6 = arith.addf %4, %5 : vector<1x64xf32>
    %c0_5 = arith.constant 0 : index
    %c0_6 = arith.constant 0 : index
    %7 = vector.load %arg6[%c0_5, %c0_6] : memref<2x64xf32, #tpu.memory_space<vmem>>, vector<1x64xf32>
    tpu.vector_store %arg6[%c0_5, %c0_6], %6 {strides = array<i32>} : memref<2x64xf32, #tpu.memory_space<vmem>>, vector<1x64xf32>,
    %c1 = arith.constant 1 : index
    %c0_7 = arith.constant 0 : index
    %8 = vector.load %arg6[%c1, %c0_7] : memref<2x64xf32, #tpu.memory_space<vmem>>, vector<1x64xf32>
    %cst_8 = arith.constant dense<0xFF800000> : vector<1x64xf32>
    %9 = vector.multi_reduction <maximumf>, %3, %cst_8 [2] : vector<1x64x256xf32> to vector<1x64xf32>
    %10 = arith.maximumf %8, %9 : vector<1x64xf32>
    %c1_9 = arith.constant 1 : index
    %c0_10 = arith.constant 0 : index
    %11 = vector.load %arg6[%c1_9, %c0_10] : memref<2x64xf32, #tpu.memory_space<vmem>>, vector<1x64xf32>
    tpu.vector_store %arg6[%c1_9, %c0_10], %10 {strides = array<i32>} : memref<2x64xf32, #tpu.memory_space<vmem>>, vector<1x64xf32>,
    %c0_i32_11 = arith.constant 0 : i32
    %12 = arith.cmpi eq, %arg1, %c0_i32_11 : i32
    %13 = arith.extui %12 : i1 to i32
    %c0_i32_12 = arith.constant 0 : i32
    %14 = arith.cmpi ne, %13, %c0_i32_12 : i32
    scf.if %14 {
      %c0_13 = arith.constant 0 : index
      %c0_14 = arith.constant 0 : index
      %15 = vector.load %arg6[%c0_13, %c0_14] : memref<2x64xf32, #tpu.memory_space<vmem>>, vector<1x64xf32>
      %cst_15 = arith.constant 3.906250e-03 : f32
      %16 = vector.broadcast %cst_15 : f32 to vector<1x64xf32>
      %17 = arith.mulf %15, %16 : vector<1x64xf32>
      %c0_16 = arith.constant 0 : index
      %c0_17 = arith.constant 0 : index
      %18 = vector.load %arg6[%c0_16, %c0_17] : memref<2x64xf32, #tpu.memory_space<vmem>>, vector<1x64xf32>
      tpu.vector_store %arg6[%c0_16, %c0_17], %17 {strides = array<i32>} : memref<2x64xf32, #tpu.memory_space<vmem>>, vector<1x64xf32>,
      %c0_18 = arith.constant 0 : index
      %c0_19 = arith.constant 0 : index
      %19 = vector.load %arg6[%c0_18, %c0_19] : memref<2x64xf32, #tpu.memory_space<vmem>>, vector<2x64xf32>
      %c0_20 = arith.constant 0 : index
      %c0_21 = arith.constant 0 : index
      %20 = vector.load %arg3[%c0_20, %c0_21] : memref<64x4xf32, #tpu.memory_space<vmem>>, vector<64x4xf32>
      %c0_22 = arith.constant 0 : index
      %c0_23 = arith.constant 0 : index
      %21 = vector.load %arg4[%c0_22, %c0_23] : memref<4x64xf32, #tpu.memory_space<vmem>>, vector<4x64xf32>
      %cst_24 = arith.constant dense<0.000000e+00> : vector<2x4xf32>
      %22 = tpu.matmul %19, %20, %cst_24 {dimension_numbers = #tpu.dot_dimension_numbers<[1], [0], [0], [1], [0, 0, 1, 1], [], []>} : vector<2x64xf32>, vector<64x4xf32>, vector<2x4xf32> -> vector<2x4xf32>
      %cst_25 = arith.constant 0.000000e+00 : f32
      %23 = vector.broadcast %cst_25 : f32 to vector<2x4xf32>
      %24 = arith.maximumf %22, %23 : vector<2x4xf32>
      %25 = vector.extract_strided_slice %24 {offsets = [0, 0], sizes = [1, 4], strides = [1, 1]} : vector<2x4xf32> to vector<1x4xf32>
      %26 = vector.extract_strided_slice %24 {offsets = [1, 0], sizes = [1, 4], strides = [1, 1]} : vector<2x4xf32> to vector<1x4xf32>
      %27 = arith.addf %25, %26 : vector<1x4xf32>
      %cst_26 = arith.constant dense<0.000000e+00> : vector<1x64xf32>
      %28 = tpu.matmul %27, %21, %cst_26 {dimension_numbers = #tpu.dot_dimension_numbers<[1], [0], [0], [1], [0, 0, 1, 1], [], []>} : vector<1x4xf32>, vector<4x64xf32>, vector<1x64xf32> -> vector<1x64xf32>
      %cst_27 = arith.constant 0.000000e+00 : f32
      %29 = vector.broadcast %cst_27 : f32 to vector<1x64xf32>
      %30 = arith.subf %29, %28 : vector<1x64xf32>
      %31 = math.exp %30 : vector<1x64xf32>
      %cst_28 = arith.constant 1.000000e+00 : f32
      %32 = vector.broadcast %cst_28 : f32 to vector<1x64xf32>
      %33 = arith.addf %32, %31 : vector<1x64xf32>
      %cst_29 = arith.constant 1.000000e+00 : f32
      %34 = vector.broadcast %cst_29 : f32 to vector<1x64xf32>
      %35 = arith.divf %34, %33 : vector<1x64xf32>
      %36 = vector.shape_cast %35 : vector<1x64xf32> to vector<1x1x64xf32>
      %c0_30 = arith.constant 0 : index
      %c0_31 = arith.constant 0 : index
      %c0_32 = arith.constant 0 : index
      %37 = vector.load %arg5[%c0_30, %c0_31, %c0_32] : memref<1x1x64xf32, #tpu.memory_space<vmem>>, vector<1x1x64xf32>
      tpu.vector_store %arg5[%c0_30, %c0_31, %c0_32], %36 {strides = array<i32>} : memref<1x1x64xf32, #tpu.memory_space<vmem>>, vector<1x1x64xf32>,
    } else {
    }
    return
  }
  func.func @transform_0(%arg0: i32, %arg1: i32) -> (i32, i32, i32) {
    %c0_i32 = arith.constant 0 : i32
    %c0_i32_0 = arith.constant 0 : i32
    return %arg0, %c0_i32, %arg1 : i32, i32, i32
  }
  func.func @transform_1(%arg0: i32, %arg1: i32) -> (i32, i32) {
    %c0_i32 = arith.constant 0 : i32
    %c0_i32_0 = arith.constant 0 : i32
    %c0_i32_1 = arith.constant 0 : i32
    return %c0_i32, %c0_i32_0 : i32, i32
  }
  func.func @transform_2(%arg0: i32, %arg1: i32) -> (i32, i32) {
    %c0_i32 = arith.constant 0 : i32
    %c0_i32_0 = arith.constant 0 : i32
    %c0_i32_1 = arith.constant 0 : i32
    return %c0_i32, %c0_i32_0 : i32, i32
  }
  func.func @transform_3(%arg0: i32, %arg1: i32) -> (i32, i32, i32) {
    %c0_i32 = arith.constant 0 : i32
    %c0_i32_0 = arith.constant 0 : i32
    %c0_i32_1 = arith.constant 0 : i32
    return %arg0, %c0_i32, %c0_i32_0 : i32, i32, i32
  }
}

</mosaic_0001>

<bundles_post_ra>
// kernel: cbam_channel_attention.1
= control target key start
LH: loop header
LB: loop body
LE: loop exit
PB: predicated region body
PF: predicated region fallthrough
CT: control target
= control target key end

     0   :  { %8 = vsyncpa [#allocation4], 0  ;;  %s1013_s0 = inlined_call_operand.vmem [shape: f32[2,64,256], index: 0, kind: input, shape index: {}]   ;;  %s1014_s1 = inlined_call_operand.vmem [shape: f32[64,4], index: 1, kind: input, shape index: {}]   ;;  %s1015_s2 = inlined_call_operand.vmem [shape: f32[4,64], index: 2, kind: input, shape index: {}]   ;;  %s1016_s3 = inlined_call_operand.hbm [shape: f32[2,1,64], index: 3, kind: output, shape index: {}]  }
   0x1   :  { %10 = vsyncpa [#allocation4 + $0x1], 0  ;;  %s861_s12 = smov 0   ;;  %s863_s13 = smov 0  }
   0x2   :  { %s865_s14 = smov 0   ;;  %s867_s15 = smov 0  }
   0x3   :  { %s869_s16 = smov 0   ;;  %s871_s17 = smov 0  }
   0x4 LB: > { %s648_s18 = sadd.s32 4294967295, %s835_s17   ;;  %s649_s19 = sadd.s32 4294967294, %s835_s17   ;;  %s835_s17 = sphi %s871_s17, %s16_s17   ;;  %s831_s16 = sphi %s869_s16, %s1023_s16   ;;  %s827_s15 = sphi %s867_s15, %s1022_s15   ;;  %s823_s14 = sphi %s865_s14, %s1021_s14   ;;  %s819_s13 = sphi %s863_s13, %s1020_s13   ;;  %s815_s12 = sphi %s861_s12, %s1019_s12  }
   0x5   : > { %s28_s20 = sadd.s32 1, %s831_s16  ;;  %s105_s21 = sadd.s32 1, %s823_s14 }
   0x6   : > { %p30_p0 = scmp.ge.s32.totalorder %s28_s20, 2  ;;  %p115_p1 = scmp.ne.s32.totalorder %s823_s14, %s819_s13 }
   0x7   : > { %p116_p2 = scmp.eq.s32.totalorder %s648_s18, 1  ;;  %p121_p3 = scmp.ne.s32.totalorder %s819_s13, %s815_s12 }
   0x8   : > { %s1025_s20 = smov (%p30_p0, %s28_s20), 0  ;;  %p122_p5 = scmp.eq.s32.totalorder %s649_s19, 1 }
   0x9   : > { %p901_p4 = por %p116_p2, %p115_p1  ;;  %s102_s23 = ssub.s32 %s831_s16, %s1025_s20 }
   0xa   : > { %p652_p6 = scmp.ge.s32.totalorder %s835_s17, 1  ;;  %p103_p7 = scmp.eq.s32.totalorder %s102_s23, 0 }
   0xb   : > { %p908_p8 = por %p122_p5, %p121_p3  ;;  %p159_p9 = scmp.lt.s32.totalorder %s835_s17, 3 }
   0xc   : > { %s914_s25 = scalar_select %p103_p7, %s823_s14, %s105_s21  }
   0xd   : > { %p160_p10 = pnand %p652_p6, %p159_p9 }
   0xe   : > { %p187_p11 = scmp.lt.s32.totalorder (!%p160_p10), %s827_s15, 1  ;;  %s184_s5 = sand.u32 (!%p160_p10), 1, %s819_s13  }
   0xf   : > { %163 = sbr.rel (%p160_p10) target bundleno = 647 (0x287), region = 32  ;;  %s658_s6 = sshll.u32 (!%p160_p10), %s827_s15, 4 }
  0x10   : > { %s185_s7 = scalar_lea.vmem (!%p160_p10), [#allocation3], %s184_s5  ;;  %s972_s11 = scalar_lea.hbm (!%p160_p10), %s1016_s3, %s658_s6 }
  0x11   : > { %s579_s8 = sshll.u32 (!%p160_p10), %s185_s7, 4  ;;  %s567_s18 = scalar_lea.sflag (!%p160_p10), [#allocation4], %s184_s5  ;;  %s580_s8 = int_to_ptr.vmem [resolvable:$true] %s579_s8 }
  0x12   : > { %s759_s19 = scalar_lea.vmem (!%p160_p10), %s580_s8, 16  ;;  %s840_s21 = smov (!%p160_p10), [#allocation3]  }
  0x13   : > { %p760_p12 = scmp.ne.s32.totalorder (!%p160_p10), %s580_s8, %s759_s19  ;;  %s763_s23 = sshll.u32 (!%p160_p10), %s840_s21, 4  ;;  %s764_s23 = int_to_ptr.vmem [resolvable:$false] %s763_s23 }
  0x14   : > { %s188_s26 = scalar_select %p187_p11, %s827_s15, 1  ;;  %vm200_vm0 = vcmask 516096   ;;  %v837_v28 = vmov 0.0   ;;  %v838_v33 = vmov -inf   ;;  %v400_v34 = vld [vmem:[%s1014_s1 + $0x38] sm:$0xff]  ;;  %v399_v35 = vld [vmem:[%s1014_s1 + $0x30] sm:$0xff]  ;;  %v252_v42 = vlaneseq }
  0x15   : > { %201 = vst.msk [vmem:[#allocation2] sm:$0x1] %vm200_vm0, %v837_v28  ;;  %673 = vmatprep.subr.mxu0 %v837_v28  ;;  %692 = vmatprep.subr.mxu1 %v837_v28  ;;  %202 = vst.msk [vmem:[#allocation2 + $0x1] sm:$0x1] %vm200_vm0, %v838_v33  ;;  %v398_v36 = vld [vmem:[%s1014_s1 + $0x28] sm:$0xff]  ;;  %v397_v37 = vld [vmem:[%s1014_s1 + $0x20] sm:$0xff]  ;;  %p761_p13 = pnand %p760_p12, %p901_p4  ;;  %p766_p1 = scmp.lt.s32.totalorder %s580_s8, %s764_s23 }
  0x16   : > { %s661_s27 = sshll.u32 %s188_s26, 7  ;;  %674 = vmatpush3.msra.mxu0 %v400_v34  ;;  %v396_v38 = vld [vmem:[%s1014_s1 + $0x18] sm:$0xff]  ;;  %v395_v39 = vld [vmem:[%s1014_s1 + $0x10] sm:$0xff]  ;;  %vm839_vm1 = vmmov 0   ;;  %v394_v40 = vld [vmem:[%s1014_s1 + $0x8] sm:$0xff]  ;;  %v253_v43 = vand.u32 127, %v252_v42 }
  0x17   : > { %s194_s30 = scalar_lea.vmem %s1013_s0, %s661_s27  ;;  %675 = vmatprep.subr.mxu0 %v837_v28  ;;  %689 = vmatprep.mubr.msk.f32.mxu0 %vm839_vm1, %v837_v28  ;;  %v393_v41 = vld [vmem:[%s1014_s1] sm:$0xff]  ;;  %v255_v44 = vshrl.u32 %v252_v42, 7  ;;  %vm263_vm2 = vcmask 130112   ;;  %vm270_vm3 = vcmask 195712   ;;  %vm277_vm4 = vcmask 261312   ;;  %p762_p0 = pneg %p761_p13 }
  0x18   : > { %v207_v0 = vld [vmem:[%s194_s30 + $0x20] sm:$0xff]  ;;  %v208_v1 = vld [vmem:[%s194_s30 + $0x28] sm:$0xff]  ;;  %v209_v5 = vld [vmem:[%s194_s30 + $0x30] sm:$0xff]  ;;  %676 = vmatpush3.msra.mxu0 %v399_v35  ;;  %694 = vmatprep.mubr.msk.f32.mxu1 %vm839_vm1, %v837_v28  ;;  %v272_v45 = vadd.s32 4294967272, %v253_v43  ;;  %v258_v46 = vadd.s32 4294967288, %v253_v43  ;;  %v265_v47 = vadd.s32 4294967280, %v253_v43 }
  0x19   : > { %v203_v2 = vld [vmem:[%s194_s30] sm:$0xff]  ;;  %v226_v3 = vadd.f32 %v208_v1, %v207_v0  ;;  %v204_v4 = vld [vmem:[%s194_s30 + $0x8] sm:$0xff]  ;;  %v210_v6 = vld [vmem:[%s194_s30 + $0x38] sm:$0xff]  ;;  %v318_v27 = vmax.f32 %v207_v0, %v208_v1  ;;  %677 = vmatprep.subr.mxu0 %v837_v28  ;;  %v279_v50 = vadd.s32 4294967264, %v253_v43  ;;  %v256_v51 = vsub.s32 %v253_v43, %v255_v44  ;;  %s765_s15 = scalar_lea.vmem %s764_s23, 32 }
  0x1a   : > { %v220_v7 = vadd.f32 %v204_v4, %v203_v2  ;;  %v205_v8 = vld [vmem:[%s194_s30 + $0x10] sm:$0xff]  ;;  %v206_v9 = vld [vmem:[%s194_s30 + $0x18] sm:$0xff]  ;;  %v229_v10 = vadd.f32 %v210_v6, %v209_v5  ;;  %v211_v14 = vld [vmem:[%s194_s30 + $0x40] sm:$0xff]  ;;  %v312_v25 = vmax.f32 %v203_v2, %v204_v4  ;;  %v321_v26 = vmax.f32 %v209_v5, %v210_v6  ;;  %678 = vmatpush3.msra.mxu0 %v398_v36  ;;  %p767_p2 = scmp.lt.s32.totalorder %s765_s15, %s759_s19 }
  0x1b   : > { %227 = vadd.xlane.f32.xlu1 %v226_v3  ;;  %v223_v11 = vadd.f32 %v206_v9, %v205_v8  ;;  %v213_v12 = vld [vmem:[%s194_s30 + $0x50] sm:$0xff]  ;;  %v214_v13 = vld [vmem:[%s194_s30 + $0x58] sm:$0xff]  ;;  %v212_v15 = vld [vmem:[%s194_s30 + $0x48] sm:$0xff]  ;;  %v315_v24 = vmax.f32 %v205_v8, %v206_v9  ;;  %679 = vmatprep.subr.mxu0 %v837_v28  ;;  %v275_v52 = vsub.s32 %v272_v45, %v255_v44  ;;  %v286_v55 = vadd.s32 4294967256, %v253_v43 }
  0x1c   : > { %221 = vadd.xlane.f32.xlu0 %v220_v7  ;;  %v235_v16 = vadd.f32 %v214_v13, %v213_v12  ;;  %v232_v17 = vadd.f32 %v212_v15, %v211_v14  ;;  %v217_v18 = vld [vmem:[%s194_s30 + $0x70] sm:$0xff]  ;;  %v218_v19 = vld [vmem:[%s194_s30 + $0x78] sm:$0xff]  ;;  %v215_v20 = vld [vmem:[%s194_s30 + $0x60] sm:$0xff]  ;;  %v327_v29 = vmax.f32 %v213_v12, %v214_v13  ;;  %v324_v30 = vmax.f32 %v211_v14, %v212_v15  ;;  %p768_p3 = por %p767_p2, %p766_p1 }
  0x1d   : > { %v216_v21 = vld [vmem:[%s194_s30 + $0x68] sm:$0xff]  ;;  %v241_v22 = vadd.f32 %v218_v19, %v217_v18  ;;  %v333_v31 = vmax.f32 %v217_v18, %v218_v19  ;;  %680 = vmatpush3.msra.mxu0 %v397_v37  ;;  %v261_v53 = vsub.s32 %v258_v46, %v255_v44  ;;  %v268_v54 = vsub.s32 %v265_v47, %v255_v44 }
  0x1e   : > { %v238_v23 = vadd.f32 %v216_v21, %v215_v20  ;;  %v330_v32 = vmax.f32 %v215_v20, %v216_v21  ;;  %681 = vmatprep.subr.mxu0 %v837_v28  ;;  %v282_v58 = vsub.s32 %v279_v50, %v255_v44  ;;  %v300_v59 = vadd.s32 4294967240, %v253_v43  ;;  %p769_p5 = pnand %p768_p3, %p762_p0 }
  0x1f   : > { %230 = vadd.xlane.f32.xlu1 %v229_v10  ;;  %682 = vmatpush3.msra.mxu0 %v396_v38  ;;  %v293_v63 = vadd.s32 4294967248, %v253_v43  ;;  %v289_v1 = vsub.s32 %v286_v55, %v255_v44  ;;  %vm284_vm5 = vcmask 326912   ;;  %vm291_vm6 = vcmask 392512  }
  0x20   : > { %224 = vadd.xlane.f32.xlu0 %v223_v11  ;;  %683 = vmatprep.subr.mxu0 %v837_v28  ;;  %v303_v6 = vsub.s32 %v300_v59, %v255_v44  ;;  %vm298_vm7 = vcmask 458112   ;;  %vm305_vm8 = vcmask 523712   ;;  %vm402_vm9 = vcmask 523264  }
  0x21   : > { %684 = vmatpush3.msra.mxu0 %v395_v39  ;;  %v296_v9 = vsub.s32 %v293_v63, %v255_v44  ;;  %v311_v44 = vld [vmem:[#allocation2 + $0x1] sm:$0x1]  ;;  %vm485_vm10 = vcmask 1043456   ;;  %vm481_vm11 = vcmask 31744  }
  0x22   : > { %685 = vmatprep.subr.mxu0 %v837_v28 }
  0x23   : > { %236 = vadd.xlane.f32.xlu1 %v235_v16  ;;  %686 = vmatpush3.msra.mxu0 %v394_v40  ;;  %v219_v16 = vld [vmem:[#allocation2] sm:$0x1] }
  0x24   : > { %233 = vadd.xlane.f32.xlu0 %v232_v17  ;;  %687 = vmatprep.subr.mxu0 %v837_v28 }
  0x25   : > { %688 = vmatpush3.msra.mxu0 %v393_v41 }
  0x27   : > { %242 = vadd.xlane.f32.xlu1 %v241_v22 }
  0x28   : > { %239 = vadd.xlane.f32.xlu0 %v238_v23 }
  0x2b   : > { %316 = vmax.xlane.f32.xlu1 %v315_v24 }
  0x2c   : > { %313 = vmax.xlane.f32.xlu0 %v312_v25 }
  0x2f   : > { %322 = vmax.xlane.f32.xlu1 %v321_v26 }
  0x30   : > { %319 = vmax.xlane.f32.xlu0 %v318_v27 }
  0x33   : > { %328 = vmax.xlane.f32.xlu1 %v327_v29 }
  0x34   : > { %325 = vmax.xlane.f32.xlu0 %v324_v30 }
  0x37   : > { %334 = vmax.xlane.f32.xlu1 %v333_v31 }
  0x38   : > { %331 = vmax.xlane.f32.xlu0 %v330_v32 }
  0xa4   : > { %v228_v48 = vpop.xlane.xlu1 %227 }
  0xa5   : > { %v222_v49 = vpop.xlane.xlu0 %221  ;;  %v269_v0 = vrot.slane %v228_v48, %v268_v54 }
  0xa6   : > { %v257_v60 = vrot.slane %v222_v49, %v256_v51  ;;  %v401_v49 = vld [vmem:[%s1015_s2] sm:$0xf] }
  0xa7   : > { %693 = vmatpush3.msk.msra.mxu1 %vm485_vm10, %v401_v49 }
  0xa8   : > { %v231_v56 = vpop.xlane.xlu1 %230 }
  0xa9   : > { %v225_v57 = vpop.xlane.xlu0 %224  ;;  %v276_v61 = vrot.slane %v231_v56, %v275_v52 }
  0xaa   : > { %v262_v62 = vrot.slane %v225_v57, %v261_v53 }
  0xac   : > { %v264_v2 = vsel %vm263_vm2, %v262_v62, %v257_v60  ;;  %v237_v3 = vpop.xlane.xlu1 %236 }
  0xad   : > { %v271_v4 = vsel %vm270_vm3, %v269_v0, %v264_v2  ;;  %v234_v5 = vpop.xlane.xlu0 %233  ;;  %v290_v10 = vrot.slane %v237_v3, %v289_v1 }
  0xae   : > { %v278_v7 = vsel %vm277_vm4, %v276_v61, %v271_v4  ;;  %v283_v8 = vrot.slane %v234_v5, %v282_v58 }
  0xb0   : > { %v285_v11 = vsel %vm284_vm5, %v283_v8, %v278_v7  ;;  %v243_v12 = vpop.xlane.xlu1 %242 }
  0xb1   : > { %v304_v13 = vrot.slane %v243_v12, %v303_v6  ;;  %v240_v14 = vpop.xlane.xlu0 %239  ;;  %v292_v17 = vsel %vm291_vm6, %v290_v10, %v285_v11 }
  0xb2   : > { %v297_v15 = vrot.slane %v240_v14, %v296_v9 }
  0xb4   : > { %v299_v18 = vsel %vm298_vm7, %v297_v15, %v292_v17  ;;  %v317_v19 = vpop.xlane.xlu1 %316 }
  0xb5   : > { %v306_v20 = vsel %vm305_vm8, %v304_v13, %v299_v18  ;;  %v314_v21 = vpop.xlane.xlu0 %313  ;;  %v351_v23 = vrot.slane %v317_v19, %v261_v53 }
  0xb6   : > { %v308_v22 = vadd.f32 %v306_v20, %v219_v16  ;;  %v347_v24 = vrot.slane %v314_v21, %v256_v51 }
  0xb8   : > { %310 = vst.msk [vmem:[#allocation2] sm:$0x1] %vm200_vm0, %v308_v22  ;;  %v323_v25 = vpop.xlane.xlu1 %322  ;;  %v352_v28 = vsel %vm263_vm2, %v351_v23, %v347_v24 }
  0xb9   : > { %v320_v26 = vpop.xlane.xlu0 %319  ;;  %v361_v29 = vrot.slane %v323_v25, %v275_v52 }
  0xba   : > { %v356_v27 = vrot.slane %v320_v26, %v268_v54 }
  0xbc   : > { %v357_v30 = vsel %vm270_vm3, %v356_v27, %v352_v28  ;;  %v329_v31 = vpop.xlane.xlu1 %328 }
  0xbd   : > { %v326_v32 = vpop.xlane.xlu0 %325  ;;  %v362_v35 = vsel %vm277_vm4, %v361_v29, %v357_v30  ;;  %v371_v36 = vrot.slane %v329_v31, %v289_v1 }
  0xbe   : > { %v366_v33 = vrot.slane %v326_v32, %v282_v58 }
  0xbf   : > { %v389_v34 = vld [vmem:[#allocation2] sm:$0x1] }
  0xc0   : > { %v390_v37 = vmul.f32 0.00390625, %v389_v34  ;;  %v367_v38 = vsel %vm284_vm5, %v366_v33, %v362_v35  ;;  %v335_v39 = vpop.xlane.xlu1 %334 }
  0xc1   : > { %v332_v40 = vpop.xlane.xlu0 %331  ;;  %v381_v41 = vrot.slane %v335_v39, %v303_v6  ;;  %v372_v43 = vsel %vm291_vm6, %v371_v36, %v367_v38 }
  0xc2   : > { %391 = vst.msk [vmem:[#allocation2] sm:$0x1] %vm200_vm0, %v390_v37  ;;  %v376_v42 = vrot.slane %v332_v40, %v296_v9 }
  0xc4   : > { %v377_v45 = vsel %vm298_vm7, %v376_v42, %v372_v43 }
  0xc5   : > { %v382_v46 = vsel %vm305_vm8, %v381_v41, %v377_v45 }
  0xc6   : > { %v384_v47 = vmax.f32 %v311_v44, %v382_v46 }
  0xc8   : > { %385 = vst.msk [vmem:[#allocation2 + $0x1] sm:$0x1] %vm200_vm0, %v384_v47 }
  0xcf   : > { %v392_v48 = vld [vmem:[#allocation2] sm:$0x3] }
  0xd0   : > { %690 = vmatmul.mubr.msk.f32.vlgmr.msra.gmra.mxu0 %vm402_vm9, %v392_v48 }
 0x190   : > { %v472_v50 = vpop.f32.mrf.mxu0 }
 0x191   : > { %v476_v51 = vmax.f32 %v472_v50, 0.0 }
 0x192   : > { %v691_v52 = vpop.f32.mrf.mxu0 }
 0x193   : > { %v478_v53 = vrot.slane %v476_v51, 1 }
 0x195   : > { %v480_v54 = vadd.f32 %v478_v53, %v476_v51 }
 0x197   : > { %695 = vmatmul.mubr.msk.f32.vlgmr.msra.gmra.mxu1 %vm481_vm11, %v480_v54 }
 0x257   : > { %v555_v55 = vpop.f32.mrf.mxu1 }
 0x258   : > { %v559_v56 = vsub.f32 0.0, %v555_v55 }
 0x259   : > { %v696_v57 = vpop.f32.mrf.mxu1 }
 0x25a   : > { %v560_v58 = vmul.f32 1.442695, %v559_v56 }
 0x25c   : > { %755 = vpow2.f32 %v560_v58 }
 0x269   : > { %v756_v59 = vpop.eup %755 }
 0x26a   : > { %v562_v60 = vadd.f32 1.0, %v756_v59 }
 0x26c   : > { %757 = vrcp.f32 %v562_v60 }
 0x279   : > { %v758_v61 = vpop.eup %757 }
 0x27a   : > { %565 = vst.msk [vmem:[%s185_s7] sm:$0x1] %vm200_vm0, %v758_v61 }
 0x27b   : > { %772 = shalt.err (!%p769_p5)
}
 0x27c   : > { %s773_s26 = scalar_lea.hbm %s972_s11, 16  ;;  %s777_s29 = scalar_lea.hbm %s1016_s3, 32 }
 0x27d   : > { %p774_p6 = scmp.ne.s32.totalorder %s972_s11, %s773_s26  ;;  %p778_p10 = scmp.lt.s32.totalorder %s972_s11, %s1016_s3 }
 0x27e   : > { %p779_p11 = scmp.lt.s32.totalorder %s777_s29, %s773_s26 }
 0x27f   : > { %p775_p7 = pnand %p774_p6, %p901_p4 }
 0x280   : > { %p780_p12 = por %p779_p11, %p778_p10 }
 0x281   : > { %p776_p9 = pneg %p775_p7 }
 0x283   : > { %p781_p13 = pnand %p780_p12, %p776_p9 }
 0x285   : > { %784 = shalt.err (!%p781_p13)
}
 0x286   : > { %697 = dma.vmem_to_hbm [thread:$0]  (%p901_p4), %s580_s8, 16, %s972_s11, %s567_s18  }
 0x287 PF: > { %p703_p0 = scmp.ge.s32.totalorder %s835_s17, 2  ;;  %s591_s5 = sand.u32 1, %s815_s12  }
 0x288   : > { %s592_s6 = scalar_lea.sflag [#allocation4], %s591_s5 }
 0x289   : > { %p700_p1 = pnand %p703_p0, %p908_p8 }
 0x28b   : > { %p701_p2 = pneg %p700_p1 }
 0x28d   : > { %810 = dma.done.wait (%p701_p2), %s592_s6, 16  }
 0x28e   : > { %812 = vsyncadd (%p701_p2), %s592_s6, 4294967280  ;;  %s16_s17 = sadd.s32 1, %s835_s17   ;;  %s1019_s12 = smov %s819_s13 }
 0x28f   : > { %p13_p3 = scmp.ge.s32.totalorder %s16_s17, 4   ;;  %s1020_s13 = smov %s823_s14 }
 0x290   : > { %s1021_s14 = smov %s914_s25  ;;  %s1022_s15 = smov %s831_s16 }
 0x291   : > { %s1023_s16 = smov %s1025_s20  ;;  %15 = sbr.rel (!%p13_p3) target bundleno = 4 (0x4), region = 75 }
 0x296   :  { %596 = vsyncpa [#allocation4], 1 }
 0x297   :  { %598 = vsyncpa [#allocation4 + $0x1], 1 }

</bundles_post_ra>
